<compile_context>
chip_gen: v6e
topology: v6e:2x2x1
jax: 0.10.0
libtpu: 0.0.40
codegen_flags: <defaults>
</compile_context>

<pallas_src>
import functools

import jax
import jax.numpy as jnp
from jax import lax
from jax.experimental import pallas as pl
from jax.experimental.pallas import tpu as pltpu


def _round_up(x, m):
    return ((x + m - 1) // m) * m


def _scatter_add_kernel(idx_ref, src_ref, out_ref, *, n_rows, mask_rows):
    # grid = (D tiles, F tiles, N tiles); N (reduction) is last so the output
    # block is resident across it and accumulated in place.
    n = pl.program_id(2)

    @pl.when(n == 0)
    def _():
        out_ref[...] = jnp.zeros_like(out_ref)

    d = pl.program_id(0)
    td = out_ref.shape[0]
    tn = src_ref.shape[0]

    # One-hot built directly transposed: output rows on the sublane axis,
    # contraction (src rows) on the lane axis -> native MXU layout.
    # idx_ref is a lane-dense (1, tn) int32 row vector; shift it into this dim
    # tile's local row range instead of offsetting the full iota.
    idx_local = idx_ref[...] - d * td                          # (1, tn)
    row_ids = lax.broadcasted_iota(jnp.int32, (td, tn), 0)     # (td, tn)
    onehot_t = (row_ids == idx_local).astype(src_ref.dtype)    # exact in bf16/f32

    src = src_ref[...]
    if mask_rows:
        # Last N tile is an edge block: rows >= N hold undefined VMEM.  Zero the
        # src rows themselves (not just the one-hot) so garbage indices and
        # garbage (possibly NaN) src rows both contribute exactly 0.
        grow = lax.broadcasted_iota(jnp.int32, (tn, 1), 0) + n * tn
        src = jnp.where(grow < n_rows, src, 0.0)

    # scatter-add on the MXU: one_hot^T @ src -> (td, tf), f32 accumulation.
    out_ref[...] += lax.dot_general(
        onehot_t, src,
        dimension_numbers=(((1,), (0,)), ((), ())),
        preferred_element_type=jnp.float32,
    )


@functools.partial(jax.jit, static_argnames=("dim_size",))
def onnx_scatter(src, index, dim_size):
    """output[index[i]] += src[i]  with output = zeros(dim_size, *src.shape[1:])."""
    feat_shape = src.shape[1:]
    N = src.shape[0]
    F = 1
    for dsz in feat_shape:
        F *= dsz

    # bf16 sources stay bf16 on the MXU (2x rate, half the DMA bytes); anything
    # else computes in f32.  Accumulation / output are always f32 (torch.zeros).
    # TODO(synk): on v5e an opt-in f32->bf16 cast would avoid the slow f32 MXU path.
    compute_dtype = jnp.bfloat16 if src.dtype == jnp.bfloat16 else jnp.float32
    src2 = src.reshape(N, F).astype(compute_dtype)
    idx2 = index.astype(jnp.int32).reshape(1, N)   # lane-dense row vector

    # --- tile sizes ---------------------------------------------------------
    # K (reduction) depth: 512 amortizes the per-step accumulator RMW and the
    # ~0.35us grid-step cost; capped to a multiple of 128 (lane-dense index tile)
    # for tiny N.
    tn = min(512, _round_up(N, 128))

    # F tile: lane-dense multiple of 128, up to 512 wide (unmasked vst); edge
    # blocks handle F not being a multiple.
    tf = min(512, _round_up(F, 128))

    # dim tile: the big lever -- src is re-streamed once per d tile, so make td
    # as large as VMEM comfortably allows (1024x512 f32 acc block = 2 MiB).
    td = min(1024, _round_up(dim_size, 8))

    d_tiles = pl.cdiv(dim_size, td)
    f_tiles = pl.cdiv(F, tf)
    n_tiles = pl.cdiv(N, tn)

    # Megacore / v7x: make sure the parallel (d, f) grid has >= 2 blocks so both
    # TensorCores get work.  Prefer splitting tf (no extra src HBM traffic).
    if d_tiles * f_tiles == 1:
        if tf >= 256:
            tf = max(128, _round_up(tf // 2, 128))
            f_tiles = pl.cdiv(F, tf)
        elif td >= 16:
            td = _round_up((td + 1) // 2, 8)
            d_tiles = pl.cdiv(dim_size, td)

    grid = (d_tiles, f_tiles, n_tiles)

    kernel = functools.partial(
        _scatter_add_kernel, n_rows=N, mask_rows=(N % tn != 0))

    out = pl.pallas_call(
        kernel,
        out_shape=jax.ShapeDtypeStruct((dim_size, F), jnp.float32),
        grid_spec=pltpu.PrefetchScalarGridSpec(
            num_scalar_prefetch=0,
            grid=grid,
            in_specs=[
                pl.BlockSpec((1, tn), lambda d, f, n: (0, n)),      # index row
                pl.BlockSpec((tn, tf), lambda d, f, n: (n, f)),     # src tile
            ],
            out_specs=pl.BlockSpec((td, tf), lambda d, f, n: (d, f)),  # resident acc
        ),
        compiler_params=pltpu.CompilerParams(
            dimension_semantics=("parallel", "parallel", "arbitrary"),
            vmem_limit_bytes=48 * 1024 * 1024,
        ),
    )(idx2, src2)

    return out.reshape((dim_size,) + feat_shape)


if __name__ == "__main__":
    key = jax.random.PRNGKey(0)
    k1, k2, k3, k4 = jax.random.split(key, 4)

    # Test 1: GCN-style scatter, small shapes (single reduction step, tiny tiles).
    N, H = 64, 32
    dim_size = 16
    src = jax.random.normal(k1, (N, H), dtype=jnp.float32)
    index = jax.random.randint(k2, (N,), 0, dim_size, dtype=jnp.int32)

    out = jax.block_until_ready(onnx_scatter(src, index, dim_size))
    ref = jnp.zeros((dim_size, H), jnp.float32).at[index].add(src)
    assert out.shape == ref.shape
    assert jnp.allclose(out, ref, atol=1e-5, rtol=1e-5)

    # Test 2: multiple N (reduction) tiles, edge blocks on N / F / dim_size.
    N2, H2 = 700, 200
    dim_size2 = 37
    src2 = jax.random.normal(k3, (N2, H2), dtype=jnp.float32)
    index2 = jax.random.randint(k4, (N2,), 0, dim_size2, dtype=jnp.int32)

    out2 = jax.block_until_ready(onnx_scatter(src2, index2, dim_size2))
    ref2 = jnp.zeros((dim_size2, H2), jnp.float32).at[index2].add(src2)
    assert out2.shape == ref2.shape
    assert jnp.allclose(out2, ref2, atol=1e-4, rtol=1e-4)

    print("KERNEL_OK")
</pallas_src>

<mosaic_0001>
module attributes {stable_mosaic.version = 11 : i64} {
  func.func @_scatter_add_kernel(%arg0: i32, %arg1: i32, %arg2: i32, %arg3: memref<1x128xi32, #tpu.memory_space<vmem>>, %arg4: memref<128x128xf32, #tpu.memory_space<vmem>>, %arg5: memref<8x128xf32, #tpu.memory_space<vmem>>) attributes {dimension_semantics = [#tpu.dimension_semantics<parallel>, #tpu.dimension_semantics<parallel>, #tpu.dimension_semantics<arbitrary>], iteration_bounds = array<i64: 2, 1, 1>, scalar_prefetch = 0 : i64, scratch_operands = 0 : i64, tpu.core_type = #tpu.core_type<tc>, window_params = [{transform_indices = @transform_0, window_bounds = array<i64: 1, 128>}, {transform_indices = @transform_1, window_bounds = array<i64: 128, 128>}, {transform_indices = @transform_2, window_bounds = array<i64: 8, 128>}]} {
    %c0_i32 = arith.constant 0 : i32
    %0 = arith.cmpi eq, %arg2, %c0_i32 : i32
    %1 = arith.extui %0 : i1 to i32
    %c0_i32_0 = arith.constant 0 : i32
    %2 = arith.cmpi ne, %1, %c0_i32_0 : i32
    scf.if %2 {
      %cst_9 = arith.constant 0.000000e+00 : f32
      %27 = vector.broadcast %cst_9 : f32 to vector<8x128xf32>
      %c0_10 = arith.constant 0 : index
      %c0_11 = arith.constant 0 : index
      %28 = vector.load %arg5[%c0_10, %c0_11] : memref<8x128xf32, #tpu.memory_space<vmem>>, vector<8x128xf32>
      tpu.vector_store %arg5[%c0_10, %c0_11], %27 {strides = array<i32>} : memref<8x128xf32, #tpu.memory_space<vmem>>, vector<8x128xf32>,
    } else {
    }
    %c0 = arith.constant 0 : index
    %c0_1 = arith.constant 0 : index
    %3 = vector.load %arg3[%c0, %c0_1] : memref<1x128xi32, #tpu.memory_space<vmem>>, vector<1x128xi32>
    %c8_i32 = arith.constant 8 : i32
    %4 = arith.muli %arg0, %c8_i32 : i32
    %5 = vector.broadcast %4 : i32 to vector<1x128xi32>
    %6 = arith.subi %3, %5 : vector<1x128xi32>
    %7 = tpu.iota {dimensions = array<i32: 0>} : vector<8x128xi32>
    %8 = vector.broadcast %6 : vector<1x128xi32> to vector<8x128xi32>
    %9 = arith.cmpi eq, %7, %8 : vector<8x128xi32>
    %10 = arith.extui %9 : vector<8x128xi1> to vector<8x128xi32>
    %11 = arith.sitofp %10 : vector<8x128xi32> to vector<8x128xf32>
    %c0_2 = arith.constant 0 : index
    %c0_3 = arith.constant 0 : index
    %12 = vector.load %arg4[%c0_2, %c0_3] : memref<128x128xf32, #tpu.memory_space<vmem>>, vector<128x128xf32>
    %13 = tpu.iota {dimensions = array<i32: 0>} : vector<128x1xi32>
    %c128_i32 = arith.constant 128 : i32
    %14 = arith.muli %arg2, %c128_i32 : i32
    %15 = vector.broadcast %14 : i32 to vector<128x1xi32>
    %16 = arith.addi %13, %15 : vector<128x1xi32>
    %c64_i32 = arith.constant 64 : i32
    %17 = vector.broadcast %c64_i32 : i32 to vector<128x1xi32>
    %18 = arith.cmpi slt, %16, %17 : vector<128x1xi32>
    %cst = arith.constant 0.000000e+00 : f32
    %19 = vector.shape_cast %18 : vector<128x1xi1> to vector<128x1xi1>
    %20 = vector.broadcast %19 : vector<128x1xi1> to vector<128x128xi1>
    %21 = vector.broadcast %cst : f32 to vector<128x128xf32>
    %22 = arith.select %20, %12, %21 : vector<128x128xi1>, vector<128x128xf32>
    %c0_4 = arith.constant 0 : index
    %c0_5 = arith.constant 0 : index
    %23 = vector.load %arg5[%c0_4, %c0_5] : memref<8x128xf32, #tpu.memory_space<vmem>>, vector<8x128xf32>
    %cst_6 = arith.constant dense<0.000000e+00> : vector<8x128xf32>
    %24 = tpu.matmul %11, %22, %cst_6 {dimension_numbers = #tpu.dot_dimension_numbers<[1], [0], [0], [1], [0, 0, 1, 1], [], []>} : vector<8x128xf32>, vector<128x128xf32>, vector<8x128xf32> -> vector<8x128xf32>
    %25 = arith.addf %23, %24 : vector<8x128xf32>
    %c0_7 = arith.constant 0 : index
    %c0_8 = arith.constant 0 : index
    %26 = vector.load %arg5[%c0_7, %c0_8] : memref<8x128xf32, #tpu.memory_space<vmem>>, vector<8x128xf32>
    tpu.vector_store %arg5[%c0_7, %c0_8], %25 {strides = array<i32>} : memref<8x128xf32, #tpu.memory_space<vmem>>, vector<8x128xf32>,
    return
  }
  func.func @transform_0(%arg0: i32, %arg1: i32, %arg2: i32) -> (i32, i32) {
    %c0_i32 = arith.constant 0 : i32
    %c0_i32_0 = arith.constant 0 : i32
    return %c0_i32, %arg2 : i32, i32
  }
  func.func @transform_1(%arg0: i32, %arg1: i32, %arg2: i32) -> (i32, i32) {
    %c0_i32 = arith.constant 0 : i32
    return %arg2, %arg1 : i32, i32
  }
  func.func @transform_2(%arg0: i32, %arg1: i32, %arg2: i32) -> (i32, i32) {
    %c0_i32 = arith.constant 0 : i32
    return %arg0, %arg1 : i32, i32
  }
}

</mosaic_0001>

<bundles_post_ra>
// kernel: onnx_scatter.1
= control target key start
LH: loop header
LB: loop body
LE: loop exit
PB: predicated region body
PF: predicated region fallthrough
CT: control target
= control target key end

     0   :  { %7 = vsyncpa [#allocation3], 0  ;;  %s833_s0 = inlined_call_operand.vmem [shape: s32[1,64], index: 0, kind: input, shape index: {}]   ;;  %s834_s1 = inlined_call_operand.vmem [shape: f32[64,32], index: 1, kind: input, shape index: {}]   ;;  %s835_s2 = inlined_call_operand.hbm [shape: f32[16,32], index: 2, kind: output, shape index: {}]  }
   0x1   :  { %9 = vsyncpa [#allocation3 + $0x1], 0  ;;  %s705_s9 = smov 0   ;;  %s707_s10 = smov 0  }
   0x2   :  { %s709_s11 = smov 0   ;;  %s711_s12 = smov 0  }
   0x3   :  { %s713_s13 = smov 0   ;;  %s715_s14 = smov 0  }
   0x4 LB: > { %s508_s15 = sadd.s32 4294967295, %s684_s14   ;;  %s509_s16 = sadd.s32 4294967294, %s684_s14   ;;  %s684_s14 = sphi %s715_s14, %s15_s14   ;;  %s680_s13 = sphi %s713_s13, %s842_s13   ;;  %s676_s12 = sphi %s711_s12, %s841_s12   ;;  %s672_s11 = sphi %s709_s11, %s840_s11   ;;  %s668_s10 = sphi %s707_s10, %s839_s10   ;;  %s664_s9 = sphi %s705_s9, %s838_s9  }
   0x5   : > { %s34_s17 = sadd.s32 1, %s680_s13  ;;  %s97_s18 = sadd.s32 1, %s672_s11 }
   0x6   : > { %p36_p0 = scmp.ge.s32.totalorder %s34_s17, 2  ;;  %p107_p1 = scmp.ne.s32.totalorder %s672_s11, %s668_s10 }
   0x7   : > { %p108_p2 = scmp.eq.s32.totalorder %s508_s15, 1  ;;  %p113_p3 = scmp.ne.s32.totalorder %s668_s10, %s664_s9 }
   0x8   : > { %s844_s17 = smov (%p36_p0, %s34_s17), 0  ;;  %p114_p5 = scmp.eq.s32.totalorder %s509_s16, 1 }
   0x9   : > { %p745_p4 = por %p108_p2, %p107_p1  ;;  %s92_s20 = ssub.s32 %s680_s13, %s844_s17 }
   0xa   : > { %p513_p6 = scmp.ge.s32.totalorder %s684_s14, 1  ;;  %p95_p7 = scmp.eq.s32.totalorder %s92_s20, 0 }
   0xb   : > { %p752_p8 = por %p114_p5, %p113_p3  ;;  %p154_p9 = scmp.lt.s32.totalorder %s684_s14, 3 }
   0xc   : > { %s758_s22 = scalar_select %p95_p7, %s672_s11, %s97_s18  }
   0xd   : > { %p155_p10 = pnand %p513_p6, %p154_p9 }
   0xe   : > { %s515_s25 = sshll.u32 (!%p155_p10), %s676_s12, 3  ;;  %s181_s24 = sand.u32 (!%p155_p10), 1, %s668_s10  }
   0xf   : > { %158 = sbr.rel (%p155_p10) target bundleno = 244 (0xf4), region = 28  ;;  %s519_s26 = sshll.u32 (!%p155_p10), %s676_s12, 7 }
  0x10   : > { %s793_s3 = scalar_lea.hbm (!%p155_p10), %s835_s2, %s519_s26  ;;  %s405_s4 = scalar_lea.sflag (!%p155_p10), [#allocation3], %s181_s24 }
  0x11   : > { %s689_s6 = smov (!%p155_p10), [#allocation2]  }
  0x12   : > { %s612_s7 = sshll.u32 (!%p155_p10), %s689_s6, 4  ;;  %s613_s7 = int_to_ptr.vmem [resolvable:$false] %s612_s7 }
  0x13   : > { %s614_s12 = scalar_lea.vmem (!%p155_p10), %s613_s7, 256 }
  0x14   : > { %v225_v0 = vld [vmem:[%s834_s1 + $0x38] sm:$0xff]  ;;  %v209_v1 = vlaneseq  ;;  %v686_v2 = vmov 0.0   ;;  %v224_v3 = vld [vmem:[%s834_s1 + $0x30] sm:$0xff]  ;;  %vm687_vm0 = vmmov 0   ;;  %v223_v5 = vld [vmem:[%s834_s1 + $0x28] sm:$0xff]  ;;  %v207_v7 = vstv %s515_s25  ;;  %s514_s25 = sshll.u32 %s181_s24, 3 }
  0x15   : > { %531 = vmatprep.subr.mxu0 %v686_v2  ;;  %547 = vmatprep.mubr.msk.f32.mxu0 %vm687_vm0, %v686_v2  ;;  %v205_v6 = vld [vmem:[%s833_s0] sm:$0x1]  ;;  %v221_v11 = vld [vmem:[%s834_s1 + $0x18] sm:$0xff]  ;;  %v220_v12 = vld [vmem:[%s834_s1 + $0x10] sm:$0xff]  ;;  %v688_v16 = vmov 1.0   ;;  %s183_s27 = scalar_lea.vmem [#allocation2], %s514_s25 }
  0x16   : > { %532 = vmatpush3.msra.mxu0 %v225_v0  ;;  %v210_v4 = vshrl.u32 %v209_v1, 7  ;;  %v222_v8 = vld [vmem:[%s834_s1 + $0x20] sm:$0xff]  ;;  %v208_v9 = vsub.s32 %v205_v6, %v207_v7  ;;  %v219_v14 = vld [vmem:[%s834_s1 + $0x8] sm:$0xff]  ;;  %s419_s28 = sshll.u32 %s183_s27, 4  ;;  %s420_s28 = int_to_ptr.vmem [resolvable:$true] %s419_s28 }
  0x17   : > { %533 = vmatprep.subr.mxu0 %v686_v2  ;;  %v218_v15 = vld [vmem:[%s834_s1] sm:$0xff]  ;;  %s608_s5 = scalar_lea.vmem %s420_s28, 128  ;;  %p615_p0 = scmp.lt.s32.totalorder %s420_s28, %s613_s7 }
  0x18   : > { %534 = vmatpush3.msra.mxu0 %v224_v3  ;;  %v213_v10 = vsub.s32 0, %v210_v4  ;;  %p609_p11 = scmp.ne.s32.totalorder %s420_s28, %s608_s5  ;;  %p616_p1 = scmp.lt.s32.totalorder %s614_s12, %s608_s5 }
  0x19   : > { %535 = vmatprep.subr.mxu0 %v686_v2 }
  0x1a   : > { %536 = vmatpush3.msra.mxu0 %v223_v5  ;;  %v214_v13 = vrot.slane %v208_v9, %v213_v10  ;;  %p610_p12 = pnand %p609_p11, %p745_p4  ;;  %p617_p2 = por %p616_p1, %p615_p0 }
  0x1b   : > { %537 = vmatprep.subr.mxu0 %v686_v2 }
  0x1c   : > { %538 = vmatpush3.msra.mxu0 %v222_v8  ;;  %vm215_vm1 = vcmp.eq.s32.totalorder %v210_v4, %v214_v13  ;;  %p611_p13 = pneg %p610_p12 }
  0x1d   : > { %539 = vmatprep.subr.mxu0 %v686_v2 }
  0x1e   : > { %540 = vmatpush3.msra.mxu0 %v221_v11  ;;  %p618_p3 = pnand %p617_p2, %p611_p13 }
  0x1f   : > { %541 = vmatprep.subr.mxu0 %v686_v2 }
  0x20   : > { %542 = vmatpush3.msra.mxu0 %v220_v12 }
  0x21   : > { %543 = vmatprep.subr.mxu0 %v686_v2 }
  0x22   : > { %544 = vmatpush3.msra.mxu0 %v219_v14 }
  0x23   : > { %545 = vmatprep.subr.mxu0 %v686_v2 }
  0x24   : > { %546 = vmatpush3.msra.mxu0 %v218_v15 }
  0x25   : > { %548 = vmatmul.mubr.msk.f32.vlgmr.msra.gmra.mxu0 %vm215_vm1, %v688_v16 }
  0xe5   : > { %v398_v17 = vpop.f32.mrf.mxu0 }
  0xe6   : > { %403 = vst [vmem:[%s183_s27] sm:$0xff] %v398_v17 }
  0xe7   : > { %v549_v18 = vpop.f32.mrf.mxu0 }
  0xe8   : > { %621 = shalt.err (!%p618_p3)
}
  0xe9   : > { %s622_s8 = scalar_lea.hbm %s793_s3, 128  ;;  %s626_s18 = scalar_lea.hbm %s835_s2, 256 }
  0xea   : > { %p623_p5 = scmp.ne.s32.totalorder %s793_s3, %s622_s8  ;;  %p627_p9 = scmp.lt.s32.totalorder %s793_s3, %s835_s2 }
  0xeb   : > { %p628_p10 = scmp.lt.s32.totalorder %s626_s18, %s622_s8 }
  0xec   : > { %p624_p6 = pnand %p623_p5, %p745_p4 }
  0xed   : > { %p629_p11 = por %p628_p10, %p627_p9 }
  0xee   : > { %p625_p7 = pneg %p624_p6 }
  0xf0   : > { %p630_p12 = pnand %p629_p11, %p625_p7 }
  0xf2   : > { %633 = shalt.err (!%p630_p12)
}
  0xf3   : > { %550 = dma.vmem_to_hbm [thread:$0]  (%p745_p4), %s420_s28, 128, %s793_s3, %s405_s4  }
  0xf4 PF: > { %p556_p13 = scmp.ge.s32.totalorder %s684_s14, 2  ;;  %s431_s24 = sand.u32 1, %s664_s9  }
  0xf5   : > { %s432_s25 = scalar_lea.sflag [#allocation3], %s431_s24 }
  0xf6   : > { %p553_p0 = pnand %p556_p13, %p752_p8 }
  0xf8   : > { %p554_p1 = pneg %p553_p0 }
  0xfa   : > { %659 = dma.done.wait (%p554_p1), %s432_s25, 128  }
  0xfb   : > { %661 = vsyncadd (%p554_p1), %s432_s25, 4294967168  ;;  %s15_s14 = sadd.s32 1, %s684_s14   ;;  %s838_s9 = smov %s668_s10 }
  0xfc   : > { %p12_p2 = scmp.ge.s32.totalorder %s15_s14, 4   ;;  %s839_s10 = smov %s672_s11 }
  0xfd   : > { %s840_s11 = smov %s758_s22  ;;  %s841_s12 = smov %s680_s13 }
  0xfe   : > { %s842_s13 = smov %s844_s17  ;;  %14 = sbr.rel (!%p12_p2) target bundleno = 4 (0x4), region = 70 }
 0x103   :  { %437 = vsyncpa [#allocation3], 1 }
 0x104   :  { %439 = vsyncpa [#allocation3 + $0x1], 1 }

</bundles_post_ra>
